<compile_context>
chip_gen: v5e
topology: v5e:2x2
jax: 0.10.0
libtpu: 0.0.40
codegen_flags: <defaults>
</compile_context>

<pallas_src>
import functools

import jax
import jax.numpy as jnp
from jax import lax
from jax.experimental import pallas as pl
from jax.experimental.pallas import tpu as pltpu


# ----------------------------------------------------------------------------
# Kernels
# ----------------------------------------------------------------------------
def _fused_kernel(x_ref, gamma_ref, beta_ref, o_ref, *, eps, m_total, m_denom):
    """Whole tensor resident in VMEM: stats + normalize in one kernel."""
    x = x_ref[...].astype(jnp.float32)                         # (N, C, HW)
    # Per-channel mean over (N, HW); reduce lane axis first, then leading axis.
    s = jnp.sum(jnp.sum(x, axis=2, keepdims=True), axis=0, keepdims=True)
    mean = s / m_total                                         # (1, C, 1)
    diff = x - mean
    # Centered, unbiased variance (matches torch .std(0); no cancellation).
    sq = jnp.sum(jnp.sum(diff * diff, axis=2, keepdims=True), axis=0,
                 keepdims=True)
    std = jnp.sqrt(sq / m_denom)                               # (1, C, 1)
    gamma = gamma_ref[...].astype(jnp.float32)                 # (1, C, 1)
    beta = beta_ref[...].astype(jnp.float32)
    scale = gamma / (std + eps)                                # eps added to std
    o_ref[...] = (diff * scale + beta).astype(o_ref.dtype)


def _row_stats_kernel(x_ref, sum_ref, sq_ref, *, hw_total, t_hw, has_tail):
    """Per-row (sum, sumsq) partials, accumulated over the HW grid axis."""
    j = pl.program_id(1)

    @pl.when(j == 0)
    def _():
        sum_ref[...] = jnp.zeros_like(sum_ref)
        sq_ref[...] = jnp.zeros_like(sq_ref)

    x = x_ref[...].astype(jnp.float32)                         # (t_r, t_hw)
    if has_tail:
        # Mask the ragged HW tail so padding never enters the sums.
        valid = hw_total - j * t_hw
        idx = lax.broadcasted_iota(jnp.int32, x.shape, dimension=1)
        x = jnp.where(idx < valid, x, 0.0)
    sum_ref[...] += jnp.sum(x, axis=1, keepdims=True)          # (t_r, 1)
    sq_ref[...] += jnp.sum(x * x, axis=1, keepdims=True)       # (t_r, 1)


def _normalize_kernel(x_ref, scale_ref, shift_ref, o_ref):
    """Streaming elementwise out = x * scale + shift (per-row scale/shift)."""
    x = x_ref[...].astype(jnp.float32)
    o_ref[...] = (x * scale_ref[...] + shift_ref[...]).astype(o_ref.dtype)


# ----------------------------------------------------------------------------
# Tiling / VMEM policy
# ----------------------------------------------------------------------------
def _vmem_capacity_bytes():
    try:
        cap = getattr(pltpu.get_tpu_info(), "vmem_capacity_bytes", None)
        if cap:
            return int(cap)
    except Exception:
        pass
    return 64 << 20   # assume the smallest (v7x) if the query fails


def _pick_tiles(n_rows, hw, itemsize, max_block_bytes):
    """Pick (t_r, t_hw) for the streaming path: blocks in the 2-8 MiB range,
    lane axis a multiple of 128 (or full extent), row axis a multiple of the
    sublane packing (or full extent)."""
    sub = {4: 8, 2: 16, 1: 32}.get(itemsize, 8)

    # Lane (HW) tile.
    if hw * itemsize * sub <= max_block_bytes:
        t_hw = hw                                          # full extent (legal)
    else:
        lane_budget = max(128, (max_block_bytes // (sub * itemsize)) // 128 * 128)
        t_hw = min(lane_budget, pl.cdiv(hw, 128) * 128)    # ragged tail masked

    # Sublane (row) tile: fold as many rows as fit the block budget.
    max_rows = max(sub, max_block_bytes // max(t_hw * itemsize, 1))
    if n_rows <= max_rows:
        t_r = n_rows                                       # full extent (legal)
    else:
        t_r = max(sub, (max_rows // sub) * sub)
    return t_r, t_hw


# ----------------------------------------------------------------------------
# Wrapper
# ----------------------------------------------------------------------------
def layer_norm_conv2d(x, gamma, beta, eps=1e-6, force_streaming=False):
    """x: (N, C, H, W).  gamma, beta: (C,).  Returns (N, C, H, W)."""
    N, C, H, W = x.shape
    HW = H * W
    M = N * HW
    # NOTE: M == 1 -> torch's unbiased std is NaN; here std=0 (out = g*0/eps + b).
    m_denom = float(max(M - 1, 1))
    itemsize = jnp.dtype(x.dtype).itemsize
    vmem_cap = _vmem_capacity_bytes()

    # ---- Fast path: single fused kernel when x comfortably fits in VMEM ----
    x_bytes = N * C * HW * itemsize
    fused_need = 2 * x_bytes + 3 * N * C * HW * 4          # in+out + f32 temps
    if (not force_streaming) and fused_need <= min(vmem_cap // 2, 48 << 20):
        x3 = x.reshape(N, C, HW)
        gamma3 = gamma.reshape(1, C, 1).astype(jnp.float32)
        beta3 = beta.reshape(1, C, 1).astype(jnp.float32)
        out3 = pl.pallas_call(
            functools.partial(_fused_kernel, eps=float(eps),
                              m_total=float(M), m_denom=m_denom),
            out_shape=jax.ShapeDtypeStruct((N, C, HW), x.dtype),
            compiler_params=pltpu.CompilerParams(
                vmem_limit_bytes=int(min(vmem_cap * 3 // 4,
                                         max(fused_need + (4 << 20), 16 << 20)))),
        )(x3, gamma3, beta3)
        return out3.reshape(N, C, H, W)

    # ---- Streaming path: two passes over x (2 reads + 1 write of x) --------
    NC = N * C
    x2 = x.reshape(NC, HW)                     # contiguous reshape, no transpose

    max_block_bytes = min(8 << 20, max(vmem_cap // 8, 2 << 20))
    t_r, t_hw = _pick_tiles(NC, HW, itemsize, max_block_bytes)
    n_r = pl.cdiv(NC, t_r)
    n_hw = pl.cdiv(HW, t_hw)
    has_tail = (HW % t_hw) != 0

    block_bytes = t_r * t_hw * itemsize
    vmem_limit = int(min(vmem_cap * 3 // 4,
                         max(6 * block_bytes + (4 << 20), 32 << 20)))

    x_spec = pl.BlockSpec((t_r, t_hw), lambda r, j: (r, j))
    vec_spec = pl.BlockSpec((t_r, 1), lambda r, j: (r, 0))

    # Pass 1: per-row raw (sum, sumsq).  Row axis "parallel" -> v7x megacore.
    row_sum, row_sq = pl.pallas_call(
        functools.partial(_row_stats_kernel, hw_total=HW, t_hw=t_hw,
                          has_tail=has_tail),
        out_shape=(jax.ShapeDtypeStruct((NC, 1), jnp.float32),
                   jax.ShapeDtypeStruct((NC, 1), jnp.float32)),
        grid_spec=pltpu.PrefetchScalarGridSpec(
            num_scalar_prefetch=0,
            grid=(n_r, n_hw),
            in_specs=[x_spec],
            out_specs=(vec_spec, vec_spec)),
        compiler_params=pltpu.CompilerParams(
            dimension_semantics=("parallel", "arbitrary"),
            vmem_limit_bytes=vmem_limit),
    )(x2)

    # Tiny per-channel epilogue in plain JAX (hoists divide/subtract out of
    # the hot loop and makes the per-N partial reduction trivial).
    ch_sum = row_sum.reshape(N, C).sum(axis=0)
    ch_sq = row_sq.reshape(N, C).sum(axis=0)
    mean = ch_sum / M
    # TODO(synk): f32 E[x^2]-E[x]^2 can cancel for huge M with |mean| >> std;
    # switch to a Chan-style centered per-block merge if that regime matters.
    var = jnp.maximum((ch_sq - M * mean * mean) / m_denom, 0.0)
    std = jnp.sqrt(var)
    scale_c = gamma.astype(jnp.float32) / (std + eps)
    shift_c = beta.astype(jnp.float32) - mean * scale_c
    scale_r = jnp.tile(scale_c.reshape(1, C), (N, 1)).reshape(NC, 1)
    shift_r = jnp.tile(shift_c.reshape(1, C), (N, 1)).reshape(NC, 1)

    # Pass 2: streaming normalize (pure elementwise, fully parallel).
    out2 = pl.pallas_call(
        _normalize_kernel,
        out_shape=jax.ShapeDtypeStruct((NC, HW), x.dtype),
        grid_spec=pltpu.PrefetchScalarGridSpec(
            num_scalar_prefetch=0,
            grid=(n_r, n_hw),
            in_specs=[x_spec, vec_spec, vec_spec],
            out_specs=pl.BlockSpec((t_r, t_hw), lambda r, j: (r, j))),
        compiler_params=pltpu.CompilerParams(
            dimension_semantics=("parallel", "parallel"),
            vmem_limit_bytes=vmem_limit),
    )(x2, scale_r, shift_r)

    return out2.reshape(N, C, H, W)


# ----------------------------------------------------------------------------
# Reference & test
# ----------------------------------------------------------------------------
def _reference(x, gamma, beta, eps=1e-6):
    # Pure-JAX re-implementation of the PyTorch forward for verification.
    N, C, H, W = x.shape
    x_flat = jnp.transpose(x, (0, 3, 2, 1)).reshape(-1, C)   # transpose(1,-1).view(-1,C)
    mean = x_flat.mean(axis=0)
    std = jnp.sqrt(jnp.sum((x_flat - mean) ** 2, axis=0) / (x_flat.shape[0] - 1))
    mean_b = mean.reshape(1, C, 1, 1)
    std_b = std.reshape(1, C, 1, 1)
    g = gamma.reshape(1, C, 1, 1)
    b = beta.reshape(1, C, 1, 1)
    return g * (x - mean_b) / (std_b + eps) + b


if __name__ == "__main__":
    key = jax.random.PRNGKey(0)

    # Shapes consistent with the module (small): N=2, C=4, H=W=16.
    N, C, H, W = 2, 4, 16, 16
    x = jax.random.normal(key, (N, C, H, W), dtype=jnp.float32)
    # Deterministic params, matching nn.Parameter(torch.ones/zeros(features)).
    gamma = jnp.ones((C,), dtype=jnp.float32)
    beta = jnp.zeros((C,), dtype=jnp.float32)

    out = layer_norm_conv2d(x, gamma, beta, eps=1e-6)
    out = jax.block_until_ready(out)
    ref = _reference(x, gamma, beta, eps=1e-6)
    assert out.shape == (N, C, H, W)
    assert jnp.allclose(out, ref, atol=1e-5, rtol=1e-5), "fused path mismatch"

    # Also exercise the streaming (two-pass) path at a small shape.
    key2 = jax.random.PRNGKey(1)
    N2, C2, H2, W2 = 2, 8, 16, 16
    x2 = jax.random.normal(key2, (N2, C2, H2, W2), dtype=jnp.float32) * 0.5 + 1.0
    g2 = jnp.linspace(0.5, 1.5, C2, dtype=jnp.float32)
    b2 = jnp.linspace(-0.2, 0.2, C2, dtype=jnp.float32)
    out2 = jax.block_until_ready(
        layer_norm_conv2d(x2, g2, b2, eps=1e-6, force_streaming=True))
    ref2 = _reference(x2, g2, b2, eps=1e-6)
    assert out2.shape == (N2, C2, H2, W2)
    assert jnp.allclose(out2, ref2, atol=1e-4, rtol=1e-4), "streaming path mismatch"

    print("KERNEL_OK")
</pallas_src>

<mosaic_0001>
module attributes {stable_mosaic.version = 11 : i64} {
  func.func @_fused_kernel(%arg0: memref<2x4x256xf32, #tpu.memory_space<vmem>>, %arg1: memref<1x4x1xf32, #tpu.memory_space<vmem>>, %arg2: memref<1x4x1xf32, #tpu.memory_space<vmem>>, %arg3: memref<2x4x256xf32, #tpu.memory_space<vmem>>) attributes {dimension_semantics = [], scalar_prefetch = 0 : i64, scratch_operands = 0 : i64, tpu.core_type = #tpu.core_type<tc>} {
    %c0 = arith.constant 0 : index
    %c0_0 = arith.constant 0 : index
    %c0_1 = arith.constant 0 : index
    %0 = vector.load %arg0[%c0, %c0_0, %c0_1] : memref<2x4x256xf32, #tpu.memory_space<vmem>>, vector<2x4x256xf32>
    %cst = arith.constant dense<0.000000e+00> : vector<2x4xf32>
    %1 = vector.multi_reduction <add>, %0, %cst [2] : vector<2x4x256xf32> to vector<2x4xf32>
    %2 = vector.shape_cast %1 : vector<2x4xf32> to vector<2x4x1xf32>
    %cst_2 = arith.constant dense<0.000000e+00> : vector<4x1xf32>
    %3 = vector.multi_reduction <add>, %2, %cst_2 [0] : vector<2x4x1xf32> to vector<4x1xf32>
    %4 = vector.shape_cast %3 : vector<4x1xf32> to vector<1x4x1xf32>
    %cst_3 = arith.constant 5.120000e+02 : f32
    %5 = vector.broadcast %cst_3 : f32 to vector<1x4x1xf32>
    %6 = arith.divf %4, %5 : vector<1x4x1xf32>
    %7 = vector.broadcast %6 : vector<1x4x1xf32> to vector<2x4x256xf32>
    %8 = arith.subf %0, %7 : vector<2x4x256xf32>
    %9 = arith.mulf %8, %8 : vector<2x4x256xf32>
    %cst_4 = arith.constant dense<0.000000e+00> : vector<2x4xf32>
    %10 = vector.multi_reduction <add>, %9, %cst_4 [2] : vector<2x4x256xf32> to vector<2x4xf32>
    %11 = vector.shape_cast %10 : vector<2x4xf32> to vector<2x4x1xf32>
    %cst_5 = arith.constant dense<0.000000e+00> : vector<4x1xf32>
    %12 = vector.multi_reduction <add>, %11, %cst_5 [0] : vector<2x4x1xf32> to vector<4x1xf32>
    %13 = vector.shape_cast %12 : vector<4x1xf32> to vector<1x4x1xf32>
    %cst_6 = arith.constant 5.110000e+02 : f32
    %14 = vector.broadcast %cst_6 : f32 to vector<1x4x1xf32>
    %15 = arith.divf %13, %14 : vector<1x4x1xf32>
    %16 = math.sqrt %15 : vector<1x4x1xf32>
    %c0_7 = arith.constant 0 : index
    %c0_8 = arith.constant 0 : index
    %c0_9 = arith.constant 0 : index
    %17 = vector.load %arg1[%c0_7, %c0_8, %c0_9] : memref<1x4x1xf32, #tpu.memory_space<vmem>>, vector<1x4x1xf32>
    %c0_10 = arith.constant 0 : index
    %c0_11 = arith.constant 0 : index
    %c0_12 = arith.constant 0 : index
    %18 = vector.load %arg2[%c0_10, %c0_11, %c0_12] : memref<1x4x1xf32, #tpu.memory_space<vmem>>, vector<1x4x1xf32>
    %cst_13 = arith.constant 9.99999997E-7 : f32
    %19 = vector.broadcast %cst_13 : f32 to vector<1x4x1xf32>
    %20 = arith.addf %16, %19 : vector<1x4x1xf32>
    %21 = arith.divf %17, %20 : vector<1x4x1xf32>
    %22 = vector.broadcast %21 : vector<1x4x1xf32> to vector<2x4x256xf32>
    %23 = arith.mulf %8, %22 : vector<2x4x256xf32>
    %24 = vector.broadcast %18 : vector<1x4x1xf32> to vector<2x4x256xf32>
    %25 = arith.addf %23, %24 : vector<2x4x256xf32>
    %c0_14 = arith.constant 0 : index
    %c0_15 = arith.constant 0 : index
    %c0_16 = arith.constant 0 : index
    %26 = vector.load %arg3[%c0_14, %c0_15, %c0_16] : memref<2x4x256xf32, #tpu.memory_space<vmem>>, vector<2x4x256xf32>
    tpu.vector_store %arg3[%c0_14, %c0_15, %c0_16], %25 {strides = array<i32>} : memref<2x4x256xf32, #tpu.memory_space<vmem>>, vector<2x4x256xf32>,
    return
  }
}

</mosaic_0001>

<bundles_post_ra>
// kernel: tpu_custom_call.1
= control target key start
LH: loop header
LB: loop body
LE: loop exit
PB: predicated region body
PF: predicated region fallthrough
CT: control target
= control target key end

     0   :  { %8 = vsyncpa [#allocation3], 0  ;;  %s328_s0 = inlined_call_operand.hbm [shape: f32[2,4,256], index: 0, kind: input, shape index: {}]   ;;  %s329_s1 = inlined_call_operand.vmem [shape: f32[1,4,1], index: 1, kind: input, shape index: {}]   ;;  %s330_s2 = inlined_call_operand.vmem [shape: f32[1,4,1], index: 2, kind: input, shape index: {}]   ;;  %s331_s3 = inlined_call_operand.hbm [shape: f32[2,4,256], index: 3, kind: output, shape index: {}]  }
   0x1   :  { %9 = vsyncpa [#allocation4], 0  ;;  %s14_s14 = sshll.u32 %s328_s0, 4  ;;  %s255_s15 = smov [#allocation2]   ;;  %s15_s14 = int_to_ptr.hbm [resolvable:$true] %s14_s14 }
   0x2   :  { %s16_s16 = sshll.u32 %s255_s15, 4  ;;  %s256_s17 = smov 128   ;;  %s17_s16 = int_to_ptr.vmem [resolvable:$true] %s16_s16 }
   0x3   :  { %s257_s18 = smov 8  }
   0x4   :  { %22 = dma.hbm_to_vmem [thread:$0]  %s15_s14, 256, %s17_s16, [#allocation3], %s256_s17, %s256_s17, %s257_s18  }
   0x5   :  { %251 = dma.done.wait [#allocation3], 256  }
   0x6   :  { %252 = vsyncadd [#allocation3], 4294967040  ;;  %v31_v0 = vld [vmem:[#allocation2] sm:$0xff]  ;;  %v32_v1 = vld [vmem:[#allocation2 + $0x8] sm:$0xff]  ;;  %vm46_vm0 = vcmask 1043456   ;;  %v258_v12 = vmov 512.0  }
   0x7   :  { %35 = vst [vmem:[#allocation1] ss:$2 sm:$0xff] %v31_v0  ;;  %195 = vrcp.f32 %v258_v12  ;;  %v259_v19 = vmov 839922192   ;;  %v260_v43 = vmov 511.0   ;;  %v261_v45 = vmov 0  }
   0x8   :  { %39 = vst [vmem:[#allocation1 + $0x10] ss:$2 sm:$0xff] %v32_v1  ;;  %v70_v20 = vunpack.c.l.s4 %v259_v19  ;;  %197 = vrcp.f32 %v260_v43  ;;  %193 = vset.pattern.permute.xlu2 %v261_v45  ;;  %194 = vset.pattern.permute.xlu0 %v261_v45  ;;  %s172_s25 = sshll.u32 %s331_s3, 4  ;;  %s173_s25 = int_to_ptr.hbm [resolvable:$true] %s172_s25 }
   0xa   :  { %v295_v25 = vunpack.c.0.s8 %v70_v20 }
   0xd   :  { %v196_v13 = vpop.eup %195 }
   0xe   :  { %v36_v2 = vld.sshfl [vmem:[#allocation1] sm:$0xff pattern:$0x75316420]  ;;  %v37_v3 = vld.sshfl [vmem:[#allocation1 + $0x8] sm:$0xff pattern:$0x75316420]  ;;  %vm65_vm1 = vweird.f32 %v196_v13  ;;  %v198_v44 = vpop.eup %197 }
   0xf   :  { %v47_v4 = vsel %vm46_vm0, %v36_v2, 0.0  ;;  %v48_v5 = vsel %vm46_vm0, %v37_v3, 0.0  ;;  %v40_v7 = vld.sshfl [vmem:[#allocation1 + $0x10] sm:$0xff pattern:$0x75316420]  ;;  %v61_v14 = vmul.f32 512.0, %v196_v13  ;;  %vm109_vm2 = vweird.f32 %v198_v44 }
  0x10   :  { %v49_v6 = vadd.f32 %v48_v5, %v47_v4  ;;  %v41_v8 = vld.sshfl [vmem:[#allocation1 + $0x18] sm:$0xff pattern:$0x75316420]  ;;  %v52_v9 = vsel %vm46_vm0, %v40_v7, 0.0  ;;  %v105_v46 = vmul.f32 511.0, %v198_v44 }
  0x11   :  { %v53_v10 = vsel %vm46_vm0, %v41_v8, 0.0  ;;  %v62_v15 = vsub.f32 1.0, %v61_v14 }
  0x12   :  { %50 = vadd.xlane.f32.xlu0 %v49_v6  ;;  %v54_v11 = vadd.f32 %v53_v10, %v52_v9  ;;  %v106_v47 = vsub.f32 1.0, %v105_v46 }
  0x13   :  { %v63_v17 = vmul.f32 %v196_v13, %v62_v15 }
  0x14   :  { %v107_v49 = vmul.f32 %v198_v44, %v106_v47 }
  0x15   :  { %v64_v18 = vadd.f32 %v196_v13, %v63_v17 }
  0x16   :  { %v108_v50 = vadd.f32 %v198_v44, %v107_v49 }
  0x17   :  { %v66_v23 = vsel %vm65_vm1, %v196_v13, %v64_v18 }
  0x18   :  { %v110_v53 = vsel %vm109_vm2, %v198_v44, %v108_v50 }
  0x1a   :  { %55 = vadd.xlane.f32.xlu0 %v54_v11  ;;  %v124_v11 = vld [vmem:[%s329_s1] sm:$0xf]  ;;  %s262_s1 = smov [#allocation5]  }
  0x1b   :  { %s170_s22 = sshll.u32 %s262_s1, 4  ;;  %s171_s22 = int_to_ptr.vmem [resolvable:$true] %s170_s22 }
  0x85   :  { %v51_v16 = vpop.xlane.xlu0 %50 }
  0x86   :  { %v57_v22 = vsel %vm46_vm0, %v51_v16, 0.0  ;;  %v125_v16 = vld [vmem:[%s330_s2] sm:$0xf] }
  0x8d   :  { %v56_v21 = vpop.xlane.xlu0 %55 }
  0x8e   :  { %v58_v24 = vsel %vm46_vm0, %v56_v21, 0.0 }
  0x8f   :  { %v59_v26 = vadd.f32 %v58_v24, %v57_v22 }
  0x91   :  { %v67_v27 = vmul.f32 %v66_v23, %v59_v26 }
  0x93   :  { %v72_v28 = vperm.slane %v67_v27, %v295_v25 }
  0x95   :  { %v298_v29 = vsub.f32 %v31_v0, %v72_v28  ;;  %v300_v30 = vsub.f32 %v32_v1, %v72_v28 }
  0x97   :  { %v76_v31 = vmul.f32 %v298_v29, %v298_v29  ;;  %v77_v32 = vmul.f32 %v300_v30, %v300_v30 }
  0x99   :  { %80 = vst [vmem:[#allocation1] ss:$2 sm:$0xff] %v76_v31 }
  0x9a   :  { %84 = vst [vmem:[#allocation1 + $0x10] ss:$2 sm:$0xff] %v77_v32 }
  0xa0   :  { %v81_v33 = vld.sshfl [vmem:[#allocation1] sm:$0xff pattern:$0x75316420]  ;;  %v82_v34 = vld.sshfl [vmem:[#allocation1 + $0x8] sm:$0xff pattern:$0x75316420] }
  0xa1   :  { %v91_v35 = vsel %vm46_vm0, %v81_v33, 0.0  ;;  %v92_v36 = vsel %vm46_vm0, %v82_v34, 0.0  ;;  %v85_v38 = vld.sshfl [vmem:[#allocation1 + $0x10] sm:$0xff pattern:$0x75316420] }
  0xa2   :  { %v93_v37 = vadd.f32 %v92_v36, %v91_v35  ;;  %v86_v39 = vld.sshfl [vmem:[#allocation1 + $0x18] sm:$0xff pattern:$0x75316420]  ;;  %v96_v40 = vsel %vm46_vm0, %v85_v38, 0.0 }
  0xa3   :  { %v97_v41 = vsel %vm46_vm0, %v86_v39, 0.0 }
  0xa4   :  { %94 = vadd.xlane.f32.xlu1 %v93_v37  ;;  %v98_v42 = vadd.f32 %v97_v41, %v96_v40 }
  0xac   :  { %99 = vadd.xlane.f32.xlu1 %v98_v42 }
 0x117   :  { %v95_v48 = vpop.xlane.xlu1 %94 }
 0x118   :  { %v101_v52 = vsel %vm46_vm0, %v95_v48, 0.0 }
 0x11f   :  { %v100_v51 = vpop.xlane.xlu1 %99 }
 0x120   :  { %v102_v54 = vsel %vm46_vm0, %v100_v51, 0.0 }
 0x121   :  { %v103_v55 = vadd.f32 %v102_v54, %v101_v52 }
 0x123   :  { %v111_v56 = vmul.f32 %v110_v53, %v103_v55 }
 0x125   :  { %199 = vrsqrt.f32 %v111_v56  ;;  %vm119_vm3 = vcmp.eq.f32.partialorder %v111_v56, inf  ;;  %v122_v0 = vand.u32 2147483648, %v111_v56  ;;  %vm121_vm4 = vcmp.eq.f32.partialorder %v111_v56, 0.0 }
 0x12b   :  { %v200_v57 = vpop.eup %199 }
 0x12c   :  { %v113_v58 = vmul.f32 %v200_v57, %v111_v56 }
 0x12e   :  { %v114_v59 = vmul.f32 %v200_v57, %v113_v58 }
 0x130   :  { %v115_v60 = vmul.f32 0.5, %v114_v59 }
 0x132   :  { %v116_v61 = vsub.f32 1.5, %v115_v60 }
 0x134   :  { %v117_v62 = vmul.f32 %v200_v57, %v116_v61 }
 0x136   :  { %v118_v63 = vmul.f32 %v117_v62, %v111_v56 }
 0x138   :  { %v120_v1 = vsel %vm119_vm3, %v111_v56, %v118_v63 }
 0x139   :  { %v123_v2 = vsel %vm121_vm4, %v122_v0, %v120_v1 }
 0x13a   :  { %v126_v3 = vadd.f32 1e-06, %v123_v2 }
 0x13c   :  { %201 = vrcp.f32 %v126_v3  ;;  %v138_v7 = vand.u32 2147483648, %v126_v3  ;;  %v136_v9 = vand.u32 2147483647, %v126_v3  ;;  %vm132_vm6 = vweird.f32 %v126_v3 }
 0x13e   :  { %v139_v12 = vor.u32 1.1754944e-38, %v138_v7  ;;  %vm137_vm8 = vcmp.eq.f32.partialorder %v136_v9, 8.507059e+37 }
 0x142   :  { %v202_v4 = vpop.eup %201 }
 0x143   :  { %v128_v5 = vmul.f32 %v202_v4, %v126_v3  ;;  %vm133_vm5 = vweird.f32 %v202_v4 }
 0x144   :  { %vm134_vm7 = vmor %vm132_vm6, %vm133_vm5 }
 0x145   :  { %v129_v6 = vsub.f32 1.0, %v128_v5 }
 0x147   :  { %v130_v8 = vmul.f32 %v202_v4, %v129_v6 }
 0x149   :  { %v131_v10 = vadd.f32 %v202_v4, %v130_v8 }
 0x14b   :  { %v135_v13 = vsel %vm134_vm7, %v202_v4, %v131_v10 }
 0x14c   :  { %v140_v14 = vsel %vm137_vm8, %v139_v12, %v135_v13 }
 0x14d   :  { %v141_v15 = vmul.f32 %v140_v14, %v124_v11 }
 0x14f   :  { %144 = vperm.xlu2 %193, %v141_v15  }
 0x157   :  { %155 = vperm.xlu2 %193, %v125_v16  }
 0x1a9   :  { %v145_v17 = vpop.permute.xlu2 %144 }
 0x1aa   :  { %v149_v18 = vperm.slane %v145_v17, %v295_v25 }
 0x1ac   :  { %v151_v20 = vmul.f32 %v149_v18, %v298_v29  ;;  %v152_v21 = vmul.f32 %v149_v18, %v300_v30 }
 0x1b1   :  { %v156_v19 = vpop.permute.xlu2 %155 }
 0x1b2   :  { %v160_v22 = vperm.slane %v156_v19, %v295_v25 }
 0x1b4   :  { %v162_v23 = vadd.f32 %v160_v22, %v151_v20  ;;  %v163_v24 = vadd.f32 %v160_v22, %v152_v21 }
 0x1b6   :  { %164 = vst [vmem:[#allocation5] sm:$0xff] %v162_v23 }
 0x1b7   :  { %165 = vst [vmem:[#allocation5 + $0x8] sm:$0xff] %v163_v24 }
 0x1b8   :  { %178 = dma.vmem_to_hbm [thread:$0]  %s171_s22, 256, %s173_s25, [#allocation4], %s256_s17, %s256_s17, %s257_s18  }
 0x1b9   :  { %253 = dma.done.wait [#allocation4], 256  }
 0x1ba   :  { %254 = vsyncadd [#allocation4], 4294967040 }
 0x1bb   :  { %183 = vsyncpa [#allocation3], 1 }
 0x1bc   :  { %184 = vsyncpa [#allocation4], 1 }

</bundles_post_ra>
